<compile_context>
chip_gen: v5e
topology: v5e:2x2
jax: 0.10.0
libtpu: 0.0.40
codegen_flags: <defaults>
</compile_context>

<pallas_src>
import functools
import math

import numpy as np
import jax
import jax.numpy as jnp
from jax import lax
from jax.experimental import pallas as pl
from jax.experimental.pallas import tpu as pltpu


# -----------------------------------------------------------------------------
# Generation-aware VMEM budgets
# -----------------------------------------------------------------------------
@functools.lru_cache(maxsize=None)
def _vmem_capacity_bytes():
    """Physical per-core VMEM (128 MiB v5e/v6e, 64 MiB v7x); safe fallback."""
    try:
        info = pltpu.get_tpu_info()
        for name in ("vmem_capacity_bytes", "vmem_size_bytes", "vmem_bytes"):
            cap = getattr(info, name, None)
            if cap:
                return int(cap)
    except Exception:
        pass
    return 64 << 20          # conservative (v7x per-core)


def _vmem_budgets():
    cap = _vmem_capacity_bytes()
    max_scoped = max(32 << 20, (cap * 3) // 4)       # never request ~all of VMEM
    block_budget = max(24 << 20, (cap * 11) // 20)   # ~55% for the block working set
    return max_scoped, block_budget


def _pick_tile(dim, target, align, require_divisor=False):
    """Largest tile <= target that satisfies TPU (8,128) block constraints."""
    if dim <= target:
        return dim                        # full dim is always a legal block
    t = (target // align) * align
    if not require_divisor:
        return t
    while t >= align:                     # reduction axis: tile must divide dim
        if dim % t == 0:
            return t
        t -= align
    return dim                            # fall back to an untiled reduction


# -----------------------------------------------------------------------------
# Tiled linear kernel: y = x @ w   (w is (Cin, Cout), stored bf16)
# -----------------------------------------------------------------------------
def _linear_kernel(x_ref, w_ref, o_ref, acc_ref):
    @pl.when(pl.program_id(2) == 0)
    def _init():
        acc_ref[...] = jnp.zeros_like(acc_ref)

    # bf16 MXU operands, f32 accumulation.
    acc_ref[...] += jnp.dot(x_ref[...].astype(jnp.bfloat16), w_ref[...],
                            preferred_element_type=jnp.float32)

    @pl.when(pl.program_id(2) == pl.num_programs(2) - 1)
    def _finalize():
        o_ref[...] = acc_ref[...].astype(o_ref.dtype)


def pallas_linear(x, w, out_dtype=None):
    M, Cin = x.shape
    Cout = w.shape[1]
    out_dtype = x.dtype if out_dtype is None else out_dtype
    out_isz = np.dtype(out_dtype).itemsize
    max_scoped, block_budget = _vmem_budgets()
    big = _vmem_capacity_bytes() >= (96 << 20)       # 128-MiB parts (v5e/v6e)

    tm = _pick_tile(M, 512 if big else 256, 16)
    tn = _pick_tile(Cout, 1024 if big else 512, 128)
    tk = _pick_tile(Cin, 1024 if big else 512, 128, require_divisor=True)

    def ws_bytes(tm_):
        return (2 * (x.dtype.itemsize * tm_ * tk + w.dtype.itemsize * tk * tn
                     + out_isz * tm_ * tn)
                + 4 * tm_ * tn)                       # double-buffered blocks + f32 acc

    while ws_bytes(tm) > block_budget and tm > 128:
        tm = max(128, (tm // 2 // 16) * 16)

    vmem_limit = int(min(max_scoped, max(32 << 20, ws_bytes(tm) + (4 << 20))))
    grid = (pl.cdiv(M, tm), pl.cdiv(Cout, tn), pl.cdiv(Cin, tk))

    return pl.pallas_call(
        _linear_kernel,
        out_shape=jax.ShapeDtypeStruct((M, Cout), out_dtype),
        grid=grid,
        in_specs=[
            pl.BlockSpec((tm, tk), lambda i, j, k: (i, k)),
            pl.BlockSpec((tk, tn), lambda i, j, k: (k, j)),
        ],
        out_specs=pl.BlockSpec((tm, tn), lambda i, j, k: (i, j)),
        scratch_shapes=[pltpu.VMEM((tm, tn), jnp.float32)],
        compiler_params=pltpu.CompilerParams(
            dimension_semantics=("parallel", "parallel", "arbitrary"),
            vmem_limit_bytes=vmem_limit),
    )(x, w)


# -----------------------------------------------------------------------------
# Fused multi-head attention kernel (one batch element x one Tq tile per step).
# Q/K/V arrive head-major, heads fused on the lane axis: (T, hg*D) / (T, hg*Dv).
# -----------------------------------------------------------------------------
def _attention_kernel(*refs, num_heads, d, dv, mask_value,
                      has_km, has_am, am_shared, has_ab, ab_shared):
    it = iter(refs)
    q_ref, k_ref, v_ref = next(it), next(it), next(it)
    km_ref = next(it) if has_km else None
    am_ref = next(it) if has_am else None
    ab_ref = next(it) if has_ab else None
    ctx_ref, att_ref = next(it), next(it)

    q = q_ref[0]                           # (tq, hg*d)  bf16, scale pre-folded
    k = k_ref[0]                           # (Tk, hg*d)  bf16
    v = v_ref[0]                           # (Tk, hg*dv) bf16
    km = km_ref[0] if has_km else None     # (1, Tk) f32 in {0, 1}

    # TODO(synk): when d/dv are not multiples of 128 the per-head lane slices
    # below cost a few lane-selects per head; zero-padding D/Dv to 128 in the
    # permuted weights would remove them at the price of wider activations.
    for h in range(num_heads):             # static unroll over heads in this group
        qh = q[:, h * d:(h + 1) * d]
        kh = k[:, h * d:(h + 1) * d]
        vh = v[:, h * dv:(h + 1) * dv]

        # scores = (scaled Q) @ K^T, contracting the last axis of both operands
        # (no explicit transpose); bf16 operands, f32 accumulation.
        s = lax.dot_general(qh, kh, (((1,), (1,)), ((), ())),
                            preferred_element_type=jnp.float32)
        if has_ab:
            s = s + ab_ref[0 if ab_shared else h]
        if has_km or has_am:
            m01 = km
            if has_am:
                am = am_ref[0 if am_shared else h]
                m01 = am if m01 is None else jnp.maximum(m01, am)   # boolean OR
            s = s + m01 * mask_value

        # softmax over keys, all f32 (works on v5e too)
        m = jnp.max(s, axis=-1, keepdims=True)
        p = jnp.exp(s - m)
        l = jnp.sum(p, axis=-1, keepdims=True)
        att = p * (1.0 / l)                # exact (tq,1) reciprocal; rows sum to 1
        att_ref[h] = att

        ctx = jnp.dot(att.astype(v.dtype), vh, preferred_element_type=jnp.float32)
        # Per-head lane-slice store into the merged (tq, hg*dv) context block.
        ctx_ref[0, :, h * dv:(h + 1) * dv] = ctx.astype(ctx_ref.dtype)


def _attention_call(Qf, Kf, Vf, km, am, am_shared, ab, ab_shared, *,
                    mask_value, hg, d, dv, tq, vmem_limit):
    N, Tq, _ = Qf.shape
    _, Tk, _ = Kf.shape

    in_specs = [
        pl.BlockSpec((1, tq, hg * d), lambda n, iq: (n, iq, 0)),
        pl.BlockSpec((1, Tk, hg * d), lambda n, iq: (n, 0, 0)),
        pl.BlockSpec((1, Tk, hg * dv), lambda n, iq: (n, 0, 0)),
    ]
    inputs = [Qf, Kf, Vf]
    if km is not None:
        in_specs.append(pl.BlockSpec((1, 1, Tk), lambda n, iq: (n, 0, 0)))
        inputs.append(km)
    if am is not None:
        if am_shared:
            in_specs.append(pl.BlockSpec((1, tq, Tk), lambda n, iq: (0, iq, 0)))
        else:
            in_specs.append(pl.BlockSpec((hg, tq, Tk), lambda n, iq: (n, iq, 0)))
        inputs.append(am)
    if ab is not None:
        if ab_shared:
            in_specs.append(pl.BlockSpec((1, tq, Tk), lambda n, iq: (0, iq, 0)))
        else:
            in_specs.append(pl.BlockSpec((hg, tq, Tk), lambda n, iq: (n, iq, 0)))
        inputs.append(ab)

    out_specs = (
        pl.BlockSpec((1, tq, hg * dv), lambda n, iq: (n, iq, 0)),
        pl.BlockSpec((hg, tq, Tk), lambda n, iq: (n, iq, 0)),
    )
    out_shape = (
        jax.ShapeDtypeStruct((N, Tq, hg * dv), jnp.bfloat16),
        jax.ShapeDtypeStruct((N * hg, Tq, Tk), jnp.float32),
    )

    kernel = functools.partial(
        _attention_kernel, num_heads=hg, d=d, dv=dv, mask_value=mask_value,
        has_km=km is not None, has_am=am is not None, am_shared=am_shared,
        has_ab=ab is not None, ab_shared=ab_shared)

    return pl.pallas_call(
        kernel,
        out_shape=out_shape,
        grid=(N, pl.cdiv(Tq, tq)),
        in_specs=in_specs,
        out_specs=out_specs,
        compiler_params=pltpu.CompilerParams(
            dimension_semantics=("parallel", "parallel"),
            vmem_limit_bytes=vmem_limit),
    )(*inputs)


def pallas_attention(Qf, Kf, Vf, km, am, am_shared, ab, ab_shared, *,
                     mask_value, num_heads, d, dv):
    N, Tq, _ = Qf.shape
    _, Tk, _ = Kf.shape
    H = num_heads
    max_scoped, block_budget = _vmem_budgets()

    def ws_bytes(tq_, hg_):
        hd, hdv = hg_ * d, hg_ * dv
        b = 2 * 2 * (tq_ * hd + Tk * hd + Tk * hdv + tq_ * hdv)   # bf16 Q/K/V/ctx, 2 bufs
        b += 2 * 4 * hg_ * tq_ * Tk                                # f32 att output, 2 bufs
        if km is not None:
            b += 2 * 4 * Tk
        if am is not None:
            b += 2 * 4 * (tq_ * Tk if am_shared else hg_ * tq_ * Tk)
        if ab is not None:
            b += 2 * 4 * (tq_ * Tk if ab_shared else hg_ * tq_ * Tk)
        b += 4 * 4 * tq_ * Tk + (2 << 20)                          # temporaries + slack
        return b

    # Keep the MXU M dimension healthy: prefer tq=256, never drop below 128.
    tq = _pick_tile(Tq, 256, 16)
    if ws_bytes(tq, H) > block_budget:
        tq = _pick_tile(Tq, 128, 16)
    # VMEM escape hatch (long Tk / small VMEM): split heads into groups instead
    # of shrinking tq — the full-Tk K/V and per-head score terms cannot shrink
    # otherwise while `att` must be returned.
    hg = H
    while hg > 1 and ws_bytes(tq, hg) > block_budget:
        nxt = hg - 1
        while hg % nxt:
            nxt -= 1
        hg = nxt

    vmem_limit = int(min(max_scoped, max(32 << 20, ws_bytes(tq, hg) + (4 << 20))))
    call = functools.partial(_attention_call, mask_value=mask_value, d=d, dv=dv,
                             tq=tq, vmem_limit=vmem_limit)

    if hg == H:
        return call(Qf, Kf, Vf, km, am, am_shared, ab, ab_shared, hg=H)

    ctxs, atts = [], []
    for g in range(H // hg):
        sl_d = slice(g * hg * d, (g + 1) * hg * d)
        sl_dv = slice(g * hg * dv, (g + 1) * hg * dv)
        am_g = am if (am is None or am_shared) else \
            am.reshape(N, H, Tq, Tk)[:, g * hg:(g + 1) * hg].reshape(N * hg, Tq, Tk)
        ab_g = ab if (ab is None or ab_shared) else \
            ab.reshape(N, H, Tq, Tk)[:, g * hg:(g + 1) * hg].reshape(N * hg, Tq, Tk)
        c, a = call(Qf[:, :, sl_d], Kf[:, :, sl_d], Vf[:, :, sl_dv],
                    km, am_g, am_shared, ab_g, ab_shared, hg=hg)
        ctxs.append(c)
        atts.append(a.reshape(N, hg, Tq, Tk))
    ctx = jnp.concatenate(ctxs, axis=-1)
    att = jnp.concatenate(atts, axis=1).reshape(N * H, Tq, Tk)
    return ctx, att


# -----------------------------------------------------------------------------
# Module wrapper
# -----------------------------------------------------------------------------
class MultiHeadAttentionPallas:
    def __init__(self, model_dim, num_heads, qk_proj_dim=None, v_proj_dim=None,
                 att_scale=None, mask_value=-1e9, *, key):
        if qk_proj_dim is None:
            qk_proj_dim = model_dim // num_heads
        if v_proj_dim is None:
            v_proj_dim = qk_proj_dim
        self.model_dim = model_dim
        self.qk_proj_dim = qk_proj_dim
        self.v_proj_dim = v_proj_dim
        self.num_heads = num_heads
        self.att_scale = qk_proj_dim ** (-0.5) if att_scale is None else att_scale
        self.mask_value = mask_value

        # Deterministic init, nn.Linear-style uniform(-1/sqrt(fan_in), 1/sqrt(fan_in)).
        # Biases are disabled (PyTorch defaults: q/k/v/out_bias = False).
        k1, k2, k3, k4 = jax.random.split(key, 4)

        def linear_w(kk, out_dim, in_dim):
            bound = 1.0 / math.sqrt(in_dim)
            return jax.random.uniform(kk, (out_dim, in_dim), jnp.float32, -bound, bound)

        C, H, D, Dv = model_dim, num_heads, qk_proj_dim, v_proj_dim
        # Original PyTorch-layout f32 weights (used by the pure-JAX reference).
        self.wq = linear_w(k1, D * H, C)
        self.wk = linear_w(k2, D * H, C)
        self.wv = linear_w(k3, Dv * H, C)
        self.wo = linear_w(k4, C, Dv * H)

        def head_major_t(w, dim):      # (dim*H, C) -> (C, H*dim), head-major cols
            return w.reshape(dim, H, C).transpose(1, 0, 2).reshape(H * dim, C).T

        # One-time permutation + att_scale fold + bf16 cast: the Pallas path
        # needs no activation transposes and no per-score `* att_scale`.
        self.wq_hm_t = (head_major_t(self.wq, D) * self.att_scale).astype(jnp.bfloat16)
        self.wk_hm_t = head_major_t(self.wk, D).astype(jnp.bfloat16)
        self.wv_hm_t = head_major_t(self.wv, Dv).astype(jnp.bfloat16)
        self.wo_hm_t = (self.wo.reshape(C, Dv, H).transpose(2, 1, 0)
                        .reshape(H * Dv, C).astype(jnp.bfloat16))
        # TODO(synk): att_drop / proj_drop are identity (p=0 / eval mode) and omitted.

    def __call__(self, q, k, v, key_mask=None, att_mask=None, att_bias=None):
        N, Tq, C = q.shape
        _, Tk, _ = k.shape
        H, D, Dv = self.num_heads, self.qk_proj_dim, self.v_proj_dim

        # Input projections -> bf16 activations, head-major, heads fused on lanes.
        # TODO(synk): a fused QKV projection for self-attention would read q once,
        # but the wrapper-side split would add an extra HBM round-trip (pallas
        # outputs are opaque to XLA fusion), so three calls are kept.
        Qf = pallas_linear(q.reshape(N * Tq, C), self.wq_hm_t,
                           out_dtype=jnp.bfloat16).reshape(N, Tq, H * D)
        Kf = pallas_linear(k.reshape(N * Tk, C), self.wk_hm_t,
                           out_dtype=jnp.bfloat16).reshape(N, Tk, H * D)
        Vf = pallas_linear(v.reshape(N * Tk, C), self.wv_hm_t,
                           out_dtype=jnp.bfloat16).reshape(N, Tk, H * Dv)

        # Masks / bias at (near-)native shapes — boolean OR with key_mask and the
        # * mask_value happen in-kernel; no (N*H, Tq, Tk) additive tensor is
        # materialized unless the mask/bias is itself per-batch/per-head.
        km = None
        if key_mask is not None:
            km = key_mask.astype(jnp.float32).reshape(N, 1, Tk)
        am, am_shared = None, True
        if att_mask is not None:
            a01 = att_mask.astype(jnp.float32)
            am_shared = (a01.ndim <= 2) or (a01.shape[0] == 1)
            am = jnp.broadcast_to(a01, (1, Tq, Tk) if am_shared else (N * H, Tq, Tk))
        ab, ab_shared = None, True
        if att_bias is not None:
            b01 = att_bias.astype(jnp.float32)
            ab_shared = (b01.ndim <= 2) or (b01.shape[0] == 1)
            ab = jnp.broadcast_to(b01, (1, Tq, Tk) if ab_shared else (N * H, Tq, Tk))

        # Fused attention: scores, softmax and context for all heads of one batch
        # element (and one Tq tile) per grid step; merged (N, Tq, H*Dv) context.
        x, att = pallas_attention(Qf, Kf, Vf, km, am, am_shared, ab, ab_shared,
                                  mask_value=self.mask_value,
                                  num_heads=H, d=D, dv=Dv)

        # Output projection (weight rows pre-permuted to the head-major merged
        # layout, so no transpose of x is needed).
        O = pallas_linear(x.reshape(N * Tq, H * Dv), self.wo_hm_t,
                          out_dtype=jnp.float32).reshape(N, Tq, self.model_dim)
        return O, att


# -----------------------------------------------------------------------------
# Pure-JAX reference (mirrors the PyTorch forward, original f32 weights).
# -----------------------------------------------------------------------------
def reference_forward(mha, q, k, v, key_mask=None, att_mask=None, att_bias=None):
    N, Tq, C = q.shape
    _, Tk, _ = k.shape
    H, D, Dv = mha.num_heads, mha.qk_proj_dim, mha.v_proj_dim
    Q = (q @ mha.wq.T).reshape(N, Tq, D, H).transpose(0, 3, 1, 2).reshape(N * H, Tq, D)
    K = (k @ mha.wk.T).reshape(N, Tk, D, H).transpose(0, 3, 1, 2).reshape(N * H, Tk, D)
    V = (v @ mha.wv.T).reshape(N, Tk, Dv, H).transpose(0, 3, 1, 2).reshape(N * H, Tk, Dv)
    kv_mask = jnp.zeros((N * H, Tq, Tk), dtype=bool)
    if key_mask is not None:
        km = jnp.tile(key_mask[:, None, None, :].astype(bool),
                      (1, H, Tq, 1)).reshape(N * H, Tq, Tk)
        kv_mask = kv_mask | km
    if att_mask is not None:
        kv_mask = kv_mask | jnp.broadcast_to(att_mask.astype(bool), (N * H, Tq, Tk))
    att = jnp.einsum("bqd,bkd->bqk", Q, K) * mha.att_scale
    if att_bias is not None:
        att = att + att_bias
    att = att + kv_mask.astype(jnp.float32) * mha.mask_value
    att = jax.nn.softmax(att, axis=-1)
    x = jnp.einsum("bqk,bkd->bqd", att, V)
    x = x.reshape(N, H, Tq, Dv).transpose(0, 2, 3, 1).reshape(N, Tq, Dv * H)
    return x @ mha.wo.T, att


if __name__ == "__main__":
    model_dim, num_heads = 32, 4
    N, Tq, Tk = 2, 8, 8

    key = jax.random.PRNGKey(0)
    kq, kk_, kv_, kb, kparams = jax.random.split(key, 5)
    q = jax.random.normal(kq, (N, Tq, model_dim), jnp.float32)
    k = jax.random.normal(kk_, (N, Tk, model_dim), jnp.float32)
    v = jax.random.normal(kv_, (N, Tk, model_dim), jnp.float32)

    mha = MultiHeadAttentionPallas(model_dim, num_heads, key=kparams)

    TOL = 2.5e-2  # bf16 MXU operands (f32 accumulation) vs the pure-f32 reference

    def check(out, ref):
        err = float(jnp.max(jnp.abs(out.astype(jnp.float32) - ref)))
        assert jnp.allclose(out, ref, atol=TOL, rtol=TOL), f"max abs err {err}"

    # Case 1: no masks / no bias.
    O, att = mha(q, k, v)
    jax.block_until_ready((O, att))
    O_ref, att_ref = reference_forward(mha, q, k, v)
    assert O.shape == (N, Tq, model_dim)
    assert att.shape == (N * num_heads, Tq, Tk)
    check(O, O_ref)
    check(att, att_ref)

    # Case 2: key padding mask (True = masked) — tiny in-kernel (N,1,Tk) bias path.
    key_mask = jnp.zeros((N, Tk), dtype=bool).at[:, -2:].set(True)
    O2, att2 = mha(q, k, v, key_mask=key_mask)
    jax.block_until_ready((O2, att2))
    O2_ref, att2_ref = reference_forward(mha, q, k, v, key_mask=key_mask)
    check(O2, O2_ref)
    check(att2, att2_ref)

    # Case 3: key mask + shared causal att_mask + shared att_bias — exercises the
    # in-kernel boolean-OR / bias path (no (N*H,Tq,Tk) mask tensor materialized).
    att_mask = ~jnp.tril(jnp.ones((Tq, Tk), dtype=bool))
    att_bias = 0.1 * jax.random.normal(kb, (Tq, Tk), jnp.float32)
    O3, att3 = mha(q, k, v, key_mask=key_mask, att_mask=att_mask, att_bias=att_bias)
    jax.block_until_ready((O3, att3))
    O3_ref, att3_ref = reference_forward(mha, q, k, v, key_mask=key_mask,
                                         att_mask=att_mask, att_bias=att_bias)
    check(O3, O3_ref)
    check(att3, att3_ref)

    print("KERNEL_OK")
</pallas_src>

<mosaic_0001>
module attributes {stable_mosaic.version = 11 : i64} {
  func.func @_linear_kernel(%arg0: i32, %arg1: i32, %arg2: i32, %arg3: memref<16x32xf32, #tpu.memory_space<vmem>>, %arg4: memref<32x32xbf16, #tpu.memory_space<vmem>>, %arg5: memref<16x32xbf16, #tpu.memory_space<vmem>>, %arg6: memref<16x32xf32, #tpu.memory_space<vmem>>) attributes {dimension_semantics = [#tpu.dimension_semantics<parallel>, #tpu.dimension_semantics<parallel>, #tpu.dimension_semantics<arbitrary>], iteration_bounds = array<i64: 1, 1, 1>, scalar_prefetch = 0 : i64, scratch_operands = 1 : i64, tpu.core_type = #tpu.core_type<tc>, window_params = [{transform_indices = @transform_0, window_bounds = array<i64: 16, 32>}, {transform_indices = @transform_1, window_bounds = array<i64: 32, 32>}, {transform_indices = @transform_2, window_bounds = array<i64: 16, 32>}]} {
    %c0_i32 = arith.constant 0 : i32
    %0 = arith.cmpi eq, %arg2, %c0_i32 : i32
    %1 = arith.extui %0 : i1 to i32
    %c0_i32_0 = arith.constant 0 : i32
    %2 = arith.cmpi ne, %1, %c0_i32_0 : i32
    scf.if %2 {
      %cst_10 = arith.constant 0.000000e+00 : f32
      %13 = vector.broadcast %cst_10 : f32 to vector<16x32xf32>
      %c0_11 = arith.constant 0 : index
      %c0_12 = arith.constant 0 : index
      %14 = vector.load %arg6[%c0_11, %c0_12] : memref<16x32xf32, #tpu.memory_space<vmem>>, vector<16x32xf32>
      tpu.vector_store %arg6[%c0_11, %c0_12], %13 {strides = array<i32>} : memref<16x32xf32, #tpu.memory_space<vmem>>, vector<16x32xf32>,
    } else {
    }
    %c0 = arith.constant 0 : index
    %c0_1 = arith.constant 0 : index
    %3 = vector.load %arg6[%c0, %c0_1] : memref<16x32xf32, #tpu.memory_space<vmem>>, vector<16x32xf32>
    %c0_2 = arith.constant 0 : index
    %c0_3 = arith.constant 0 : index
    %4 = vector.load %arg3[%c0_2, %c0_3] : memref<16x32xf32, #tpu.memory_space<vmem>>, vector<16x32xf32>
    %5 = arith.truncf %4 : vector<16x32xf32> to vector<16x32xbf16>
    %c0_4 = arith.constant 0 : index
    %c0_5 = arith.constant 0 : index
    %6 = vector.load %arg4[%c0_4, %c0_5] : memref<32x32xbf16, #tpu.memory_space<vmem>>, vector<32x32xbf16>
    %cst = arith.constant dense<0.000000e+00> : vector<16x32xf32>
    %7 = tpu.matmul %5, %6, %cst {dimension_numbers = #tpu.dot_dimension_numbers<[1], [0], [0], [1], [0, 0, 1, 1], [], []>} : vector<16x32xbf16>, vector<32x32xbf16>, vector<16x32xf32> -> vector<16x32xf32>
    %8 = arith.addf %3, %7 : vector<16x32xf32>
    %c0_6 = arith.constant 0 : index
    %c0_7 = arith.constant 0 : index
    %9 = vector.load %arg6[%c0_6, %c0_7] : memref<16x32xf32, #tpu.memory_space<vmem>>, vector<16x32xf32>
    tpu.vector_store %arg6[%c0_6, %c0_7], %8 {strides = array<i32>} : memref<16x32xf32, #tpu.memory_space<vmem>>, vector<16x32xf32>,
    %c0_i32_8 = arith.constant 0 : i32
    %10 = arith.cmpi eq, %arg2, %c0_i32_8 : i32
    %11 = arith.extui %10 : i1 to i32
    %c0_i32_9 = arith.constant 0 : i32
    %12 = arith.cmpi ne, %11, %c0_i32_9 : i32
    scf.if %12 {
      %c0_10 = arith.constant 0 : index
      %c0_11 = arith.constant 0 : index
      %13 = vector.load %arg6[%c0_10, %c0_11] : memref<16x32xf32, #tpu.memory_space<vmem>>, vector<16x32xf32>
      %14 = arith.truncf %13 : vector<16x32xf32> to vector<16x32xbf16>
      %c0_12 = arith.constant 0 : index
      %c0_13 = arith.constant 0 : index
      %15 = vector.load %arg5[%c0_12, %c0_13] : memref<16x32xbf16, #tpu.memory_space<vmem>>, vector<16x32xbf16>
      tpu.vector_store %arg5[%c0_12, %c0_13], %14 {strides = array<i32>} : memref<16x32xbf16, #tpu.memory_space<vmem>>, vector<16x32xbf16>,
    } else {
    }
    return
  }
  func.func @transform_0(%arg0: i32, %arg1: i32, %arg2: i32) -> (i32, i32) {
    %c0_i32 = arith.constant 0 : i32
    return %arg0, %arg2 : i32, i32
  }
  func.func @transform_1(%arg0: i32, %arg1: i32, %arg2: i32) -> (i32, i32) {
    %c0_i32 = arith.constant 0 : i32
    return %arg2, %arg1 : i32, i32
  }
  func.func @transform_2(%arg0: i32, %arg1: i32, %arg2: i32) -> (i32, i32) {
    %c0_i32 = arith.constant 0 : i32
    return %arg0, %arg1 : i32, i32
  }
}

</mosaic_0001>

<bundles_post_ra>
// kernel: tpu_custom_call.1
= control target key start
LH: loop header
LB: loop body
LE: loop exit
PB: predicated region body
PF: predicated region fallthrough
CT: control target
= control target key end

     0   :  { %7 = vsyncpa [#allocation4], 0  ;;  %s265_s0 = inlined_call_operand.hbm [shape: f32[16,32], index: 0, kind: input, shape index: {}]   ;;  %s266_s1 = inlined_call_operand.hbm [shape: bf16[32,32], index: 1, kind: input, shape index: {}]   ;;  %s267_s2 = inlined_call_operand.hbm [shape: bf16[16,32], index: 2, kind: output, shape index: {}]  }
   0x1   :  { %8 = vsyncpa [#allocation7], 0 }
   0x2   :  { %9 = vsyncpa [#allocation5], 0  ;;  %s14_s11 = sshll.u32 %s265_s0, 4  ;;  %s222_s12 = smov [#allocation3]   ;;  %s15_s11 = int_to_ptr.hbm [resolvable:$true] %s14_s11 }
   0x3   :  { %s16_s13 = sshll.u32 %s222_s12, 4  ;;  %s27_s16 = sshll.u32 %s266_s1, 4  ;;  %s17_s13 = int_to_ptr.vmem [resolvable:$true] %s16_s13  ;;  %s28_s16 = int_to_ptr.hbm [resolvable:$true] %s27_s16 }
   0x4   :  { %s223_s17 = smov 128   ;;  %s224_s18 = smov 8  }
   0x5   :  { %22 = dma.hbm_to_vmem [thread:$0]  %s15_s11, 256, %s17_s13, [#allocation4], %s223_s17, %s223_s17, %s224_s18  }
   0x6   :  { %s225_s19 = smov [#allocation6]   ;;  %s226_s21 = smov 64  }
   0x7   :  { %s29_s20 = sshll.u32 %s225_s19, 4  ;;  %s227_s22 = smov 4   ;;  %s30_s20 = int_to_ptr.vmem [resolvable:$true] %s29_s20 }
   0x8   :  { %35 = dma.hbm_to_vmem [thread:$0]  %s28_s16, 256, %s30_s20, [#allocation7], %s226_s21, %s226_s21, %s227_s22  }
   0x9   :  { %216 = dma.done.wait [#allocation4], 256  }
   0xa   :  { %217 = vsyncadd [#allocation4], 4294967040 }
   0xb   :  { %218 = dma.done.wait [#allocation7], 256  }
   0xc   :  { %219 = vsyncadd [#allocation7], 4294967040  ;;  %vm49_vm0 = vcmask 261120   ;;  %v228_v0 = vmov 0.0   ;;  %v135_v1 = vld [vmem:[#allocation6 + $0x8] sm:$0xff]  ;;  %v134_v2 = vld [vmem:[#allocation6] sm:$0xff] }
   0xd   :  { %50 = vst.msk [vmem:[#allocation2] sm:$0xff] %vm49_vm0, %v228_v0  ;;  %83 = vmatpush.bf16.msra.mxu0 %v135_v1  ;;  %v54_v3 = vld [vmem:[#allocation3] sm:$0xff]  ;;  %v55_v4 = vld [vmem:[#allocation3 + $0x8] sm:$0xff]  ;;  %vm102_vm1 = vcmask 257024   ;;  %s229_s0 = smov [#allocation8]   ;;  %s111_s25 = sshll.u32 %s267_s2, 4  ;;  %s112_s25 = int_to_ptr.hbm [resolvable:$true] %s111_s25 }
   0xe   :  { %51 = vst.msk [vmem:[#allocation2 + $0x8] sm:$0xff] %vm49_vm0, %v228_v0  ;;  %v56_v5 = vpack.c.bf16 %v55_v4, %v54_v3  ;;  %s109_s1 = sshll.u32 %s229_s0, 4  ;;  %s110_s1 = int_to_ptr.vmem [resolvable:$true] %s109_s1 }
  0x11   :  { %84 = vmatpush.bf16.msra.mxu0 %v134_v2 }
  0x14   :  { %133 = vmatmul.msk.bf16.vlgmr.msra.gmra.mxu0 %vm49_vm0, %v56_v5  ;;  %v52_v6 = vld [vmem:[#allocation2] sm:$0xff] }
  0x15   :  { %v53_v9 = vld [vmem:[#allocation2 + $0x8] sm:$0xff] }
  0x91   :  { %v86_v7 = vpop.f32.mrf.mxu0 }
  0x92   :  { %v91_v8 = vadd.f32 %v86_v7, %v52_v6 }
  0x94   :  { %93 = vst.msk [vmem:[#allocation2] sm:$0xff] %vm49_vm0, %v91_v8 }
  0x99   :  { %v88_v10 = vpop.f32.mrf.mxu0 }
  0x9a   :  { %v92_v11 = vadd.f32 %v88_v10, %v53_v9 }
  0x9b   :  { %v98_v12 = vld [vmem:[#allocation2] sm:$0xff] }
  0x9c   :  { %94 = vst.msk [vmem:[#allocation2 + $0x8] sm:$0xff] %vm49_vm0, %v92_v11  ;;  %v100_v13 = vpack.c.bf16 %v98_v12, %v98_v12 }
  0x9e   :  { %103 = vst.msk [vmem:[#allocation8] sm:$0xf] %vm102_vm1, %v100_v13 }
  0xa3   :  { %v99_v14 = vld [vmem:[#allocation2 + $0x8] sm:$0xff] }
  0xa4   :  { %v101_v15 = vpack.c.bf16 %v99_v14, %v99_v14 }
  0xa6   :  { %104 = vst.msk [vmem:[#allocation8 + $0x4] sm:$0xf] %vm102_vm1, %v101_v15 }
  0xa7   :  { %117 = dma.vmem_to_hbm [thread:$0]  %s110_s1, 128, %s112_s25, [#allocation5], %s226_s21, %s226_s21, %s227_s22  }
  0xa8   :  { %220 = dma.done.wait [#allocation5], 128  }
  0xa9   :  { %221 = vsyncadd [#allocation5], 4294967168 }
  0xaa   :  { %122 = vsyncpa [#allocation4], 1 }
  0xab   :  { %123 = vsyncpa [#allocation7], 1 }
  0xac   :  { %124 = vsyncpa [#allocation5], 1 }

</bundles_post_ra>
